<compile_context>
chip_gen: v7x
topology: tpu7x:2x2x1
jax: 0.10.0
libtpu: 0.0.40
codegen_flags: <defaults>
</compile_context>

<pallas_src>
import functools

import jax
import jax.numpy as jnp
from jax.experimental import pallas as pl
from jax.experimental.pallas import tpu as pltpu

_SQRT_HALF = 0.7071067811865476


def _gelu_exact(x):
    # torch.nn.GELU() default (erf-based), evaluated in f32.
    return 0.5 * x * (1.0 + jax.lax.erf(x * _SQRT_HALF))


# ---------------------------------------------------------------------------
# Fused MLP kernel: out = fc2(gelu(fc1(x)))
# ---------------------------------------------------------------------------
def _mlp_kernel(x_ref, w1_ref, b1_ref, w2_ref, b2_ref, o_ref, *, hd_chunk, n_chunks):
    # x_ref: (TM, Cin_p)   w1_ref: (Cin_p, Hd_p)   b1_ref: (1, Hd_p)
    # w2_ref: (Hd_p, Cout_p) b2_ref: (1, Cout_p)   o_ref: (TM, Cout_p)
    bf16 = jnp.bfloat16
    use_bf16 = (x_ref.dtype == bf16) or (w1_ref.dtype == bf16) or (w2_ref.dtype == bf16)
    dot_dt = bf16 if use_bf16 else x_ref.dtype  # bf16 MXU fast path, else exact f32

    x = x_ref[...].astype(dot_dt)

    def chunk(off):
        w1c = w1_ref[:, pl.ds(off, hd_chunk)].astype(dot_dt)
        b1c = b1_ref[:, pl.ds(off, hd_chunk)].astype(jnp.float32)
        h = jnp.dot(x, w1c, preferred_element_type=jnp.float32) + b1c
        h = _gelu_exact(h)                                   # f32 bias + GELU
        w2c = w2_ref[pl.ds(off, hd_chunk), :].astype(dot_dt)
        return jnp.dot(h.astype(dot_dt), w2c, preferred_element_type=jnp.float32)

    if n_chunks == 1:
        acc = chunk(0)
    else:
        def body(c, acc):
            off = pl.multiple_of(c * hd_chunk, hd_chunk)
            return acc + chunk(off)
        acc = jax.lax.fori_loop(
            0, n_chunks, body,
            jnp.zeros((x_ref.shape[0], o_ref.shape[1]), jnp.float32))

    o_ref[...] = (acc + b2_ref[...].astype(jnp.float32)).astype(o_ref.dtype)


# ---------------------------------------------------------------------------
# Wrapper helpers
# ---------------------------------------------------------------------------
def _cdiv(a, b):
    return -(-a // b)


def _pad_axis(a, axis, mult):
    size = a.shape[axis]
    pad = (-size) % mult
    if pad == 0:
        return a
    widths = [(0, 0)] * a.ndim
    widths[axis] = (0, pad)
    return jnp.pad(a, widths)


def _vmem_capacity_bytes():
    try:
        cap = int(pltpu.get_tpu_info().vmem_capacity_bytes)
        if cap > 0:
            return cap
    except Exception:
        pass
    return 64 << 20  # conservative default (v7x per-TensorCore)


def _pick_hd_chunk(hd_p, tm, budget=8 << 20):
    """Largest multiple-of-128 divisor of hd_p whose f32 (tm, chunk) tile fits budget."""
    if tm * hd_p * 4 <= budget:
        return hd_p
    units = hd_p // 128
    for d in range(units, 0, -1):
        if units % d == 0 and tm * d * 128 * 4 <= budget:
            return d * 128
    return 128


def _vmem_need(tm, hd_chunk, cin_p, cout_p, act_isz, w_bytes):
    stream = 2 * tm * cin_p * act_isz + 2 * tm * cout_p * act_isz  # double-buffered x/out
    interm = tm * hd_chunk * 4 + tm * cout_p * 4                   # f32 hidden + accumulator
    return w_bytes + stream + interm


# ---------------------------------------------------------------------------
# Host-side wrapper
# ---------------------------------------------------------------------------
def mlp2d(x2d, w1, b1, w2, b2, *, block_m=1024):
    """x2d: (M, Cin). w1: (Cin, Hd), b1: (Hd,)|(1,Hd), w2: (Hd, Cout), b2: (Cout,)|(1,Cout)."""
    M, Cin = x2d.shape
    Hd, Cout = w2.shape
    b1 = b1.reshape(1, Hd)
    b2 = b2.reshape(1, Cout)

    # Lane-dense padding: channel dims to multiples of 128 (zeros preserve the math).
    xp = _pad_axis(x2d, 1, 128)
    w1p = _pad_axis(_pad_axis(w1, 0, 128), 1, 128)
    b1p = _pad_axis(b1, 1, 128)
    w2p = _pad_axis(_pad_axis(w2, 0, 128), 1, 128)
    b2p = _pad_axis(b2, 1, 128)
    Cin_p, Hd_p = w1p.shape
    Cout_p = w2p.shape[1]

    act_isz = jnp.dtype(x2d.dtype).itemsize
    w_bytes = (w1p.size * jnp.dtype(w1p.dtype).itemsize
               + b1p.size * jnp.dtype(b1p.dtype).itemsize
               + w2p.size * jnp.dtype(w2p.dtype).itemsize
               + b2p.size * jnp.dtype(b2p.dtype).itemsize)  # single-buffered residents

    cap = (_vmem_capacity_bytes() * 7) // 8  # per-generation VMEM cap with headroom

    # --- row-tile selection ---
    tm = min(block_m, M)
    if tm < M:
        if tm >= 256:
            tm = (tm // 256) * 256     # MXU-aligned rows on v6e/v7x
        elif tm >= 128:
            tm = 128
        else:
            tm = max(8, (tm // 8) * 8)

    # Shrink until the VMEM budget fits.
    while tm > 8 and _vmem_need(tm, _pick_hd_chunk(Hd_p, tm),
                                Cin_p, Cout_p, act_isz, w_bytes) > cap:
        nt = max(8, ((tm // 2) // 8) * 8)
        if nt == tm:
            break
        tm = nt

    # Keep both v7x TensorCores busy with pipelined work: aim for >= 4 grid steps.
    min_tm = min(M, 128)
    while _cdiv(M, tm) < 4 and tm > min_tm:
        nt = max(min_tm, ((tm // 2) // 8) * 8)
        if nt == tm:
            break
        tm = nt

    hd_chunk = _pick_hd_chunk(Hd_p, tm)
    n_chunks = Hd_p // hd_chunk
    need = _vmem_need(tm, hd_chunk, Cin_p, Cout_p, act_isz, w_bytes)
    vmem_limit = int(min(cap, max(2 * need, 16 << 20)))

    grid = (pl.cdiv(M, tm),)

    cost = pl.CostEstimate(
        flops=int(2 * M * (Cin_p * Hd_p + Hd_p * Cout_p)),
        transcendentals=int(M * Hd_p),
        bytes_accessed=int(xp.size * act_isz + M * Cout_p * act_isz + w_bytes),
    )

    kern = functools.partial(_mlp_kernel, hd_chunk=hd_chunk, n_chunks=n_chunks)
    resident = dict(pipeline_mode=pl.Buffered(1))  # constant index_map: single buffer

    out_p = pl.pallas_call(
        kern,
        out_shape=jax.ShapeDtypeStruct((M, Cout_p), x2d.dtype),
        grid=grid,
        in_specs=[
            pl.BlockSpec((tm, Cin_p), lambda i: (i, 0)),              # streamed x rows
            pl.BlockSpec((Cin_p, Hd_p), lambda i: (0, 0), **resident),  # resident fc1 W
            pl.BlockSpec((1, Hd_p), lambda i: (0, 0), **resident),      # resident fc1 b
            pl.BlockSpec((Hd_p, Cout_p), lambda i: (0, 0), **resident), # resident fc2 W
            pl.BlockSpec((1, Cout_p), lambda i: (0, 0), **resident),    # resident fc2 b
        ],
        out_specs=pl.BlockSpec((tm, Cout_p), lambda i: (i, 0)),
        compiler_params=pltpu.CompilerParams(
            dimension_semantics=("parallel",),
            vmem_limit_bytes=vmem_limit,
        ),
        cost_estimate=cost,
    )(xp, w1p, b1p, w2p, b2p)

    return out_p[:, :Cout] if Cout_p != Cout else out_p


def mlp_forward(x, params, *, block_m=1024):
    """x: (B, L, Cin) or (M, Cin). Returns same leading shape with Cout channels."""
    lead = x.shape[:-1]
    Cin = x.shape[-1]
    out2d = mlp2d(
        x.reshape(-1, Cin),
        params["fc1_w"], params["fc1_b"], params["fc2_w"], params["fc2_b"],
        block_m=block_m,
    )
    return out2d.reshape(*lead, out2d.shape[-1])


def init_params(key, in_features, hidden_features, out_features, dtype=jnp.float32):
    ks = jax.random.split(key, 4)
    s1 = 1.0 / (in_features ** 0.5)
    s2 = 1.0 / (hidden_features ** 0.5)
    return dict(
        fc1_w=jax.random.uniform(ks[0], (in_features, hidden_features),
                                 jnp.float32, -s1, s1).astype(dtype),
        fc1_b=jax.random.uniform(ks[1], (1, hidden_features),
                                 jnp.float32, -s1, s1).astype(dtype),
        fc2_w=jax.random.uniform(ks[2], (hidden_features, out_features),
                                 jnp.float32, -s2, s2).astype(dtype),
        fc2_b=jax.random.uniform(ks[3], (1, out_features),
                                 jnp.float32, -s2, s2).astype(dtype),
    )


def _mlp_reference(x, p):
    """Pure-JAX reference (matches the PyTorch forward), high-precision dots."""
    hp = jax.lax.Precision.HIGHEST
    h = jnp.dot(x, p["fc1_w"], precision=hp) + p["fc1_b"][0]
    h = _gelu_exact(h)
    return jnp.dot(h, p["fc2_w"], precision=hp) + p["fc2_b"][0]


if __name__ == "__main__":
    # Small DaViT-like shapes: B=2 images, 16x16 tokens (L=256), dim=32, mlp_ratio=4.
    B, L = 2, 256
    in_features, hidden_features, out_features = 32, 128, 32

    key = jax.random.PRNGKey(0)
    kx, kp = jax.random.split(key)
    x = jax.random.normal(kx, (B, L, in_features), jnp.float32)
    params = init_params(kp, in_features, hidden_features, out_features)

    fwd = jax.jit(functools.partial(mlp_forward, block_m=1024))
    out = jax.block_until_ready(fwd(x, params))

    assert out.shape == (B, L, out_features)
    assert bool(jnp.all(jnp.isfinite(out)))

    ref = _mlp_reference(x, params)
    err = float(jnp.max(jnp.abs(out - ref)))
    assert err < 1e-4, err
    print("KERNEL_OK")
</pallas_src>

<mosaic_0001>
module attributes {stable_mosaic.version = 11 : i64} {
  func.func @_mlp_kernel(%arg0: i32, %arg1: memref<128x128xf32, #tpu.memory_space<vmem>>, %arg2: memref<128x128xf32, #tpu.memory_space<vmem>>, %arg3: memref<1x128xf32, #tpu.memory_space<vmem>>, %arg4: memref<128x128xf32, #tpu.memory_space<vmem>>, %arg5: memref<1x128xf32, #tpu.memory_space<vmem>>, %arg6: memref<128x128xf32, #tpu.memory_space<vmem>>) attributes {dimension_semantics = [#tpu.dimension_semantics<parallel>], iteration_bounds = array<i64: 4>, scalar_prefetch = 0 : i64, scratch_operands = 0 : i64, tpu.core_type = #tpu.core_type<tc>, window_params = [{transform_indices = @transform_0, window_bounds = array<i64: 128, 128>}, {pipeline_mode = #tpu.pipeline_mode<synchronous>, transform_indices = @transform_1, window_bounds = array<i64: 128, 128>}, {pipeline_mode = #tpu.pipeline_mode<synchronous>, transform_indices = @transform_2, window_bounds = array<i64: 1, 128>}, {pipeline_mode = #tpu.pipeline_mode<synchronous>, transform_indices = @transform_3, window_bounds = array<i64: 128, 128>}, {pipeline_mode = #tpu.pipeline_mode<synchronous>, transform_indices = @transform_4, window_bounds = array<i64: 1, 128>}, {transform_indices = @transform_5, window_bounds = array<i64: 128, 128>}]} {
    %c0 = arith.constant 0 : index
    %c0_0 = arith.constant 0 : index
    %0 = vector.load %arg1[%c0, %c0_0] : memref<128x128xf32, #tpu.memory_space<vmem>>, vector<128x128xf32>
    %c0_1 = arith.constant 0 : index
    %c0_2 = arith.constant 0 : index
    %1 = vector.load %arg2[%c0_1, %c0_2] : memref<128x128xf32, #tpu.memory_space<vmem>>, vector<128x128xf32>
    %c0_3 = arith.constant 0 : index
    %c0_4 = arith.constant 0 : index
    %2 = vector.load %arg3[%c0_3, %c0_4] : memref<1x128xf32, #tpu.memory_space<vmem>>, vector<1x128xf32>
    %cst = arith.constant dense<0.000000e+00> : vector<128x128xf32>
    %3 = tpu.matmul %0, %1, %cst {dimension_numbers = #tpu.dot_dimension_numbers<[1], [0], [0], [1], [0, 0, 1, 1], [], []>} : vector<128x128xf32>, vector<128x128xf32>, vector<128x128xf32> -> vector<128x128xf32>
    %4 = vector.broadcast %2 : vector<1x128xf32> to vector<128x128xf32>
    %5 = arith.addf %3, %4 : vector<128x128xf32>
    %cst_5 = arith.constant 5.000000e-01 : f32
    %6 = vector.broadcast %cst_5 : f32 to vector<128x128xf32>
    %7 = arith.mulf %6, %5 : vector<128x128xf32>
    %cst_6 = arith.constant 0.707106769 : f32
    %8 = vector.broadcast %cst_6 : f32 to vector<128x128xf32>
    %9 = arith.mulf %5, %8 : vector<128x128xf32>
    %10 = math.erf %9 : vector<128x128xf32>
    %cst_7 = arith.constant 1.000000e+00 : f32
    %11 = vector.broadcast %cst_7 : f32 to vector<128x128xf32>
    %12 = arith.addf %11, %10 : vector<128x128xf32>
    %13 = arith.mulf %7, %12 : vector<128x128xf32>
    %c0_8 = arith.constant 0 : index
    %c0_9 = arith.constant 0 : index
    %14 = vector.load %arg4[%c0_8, %c0_9] : memref<128x128xf32, #tpu.memory_space<vmem>>, vector<128x128xf32>
    %cst_10 = arith.constant dense<0.000000e+00> : vector<128x128xf32>
    %15 = tpu.matmul %13, %14, %cst_10 {dimension_numbers = #tpu.dot_dimension_numbers<[1], [0], [0], [1], [0, 0, 1, 1], [], []>} : vector<128x128xf32>, vector<128x128xf32>, vector<128x128xf32> -> vector<128x128xf32>
    %c0_11 = arith.constant 0 : index
    %c0_12 = arith.constant 0 : index
    %16 = vector.load %arg5[%c0_11, %c0_12] : memref<1x128xf32, #tpu.memory_space<vmem>>, vector<1x128xf32>
    %17 = vector.broadcast %16 : vector<1x128xf32> to vector<128x128xf32>
    %18 = arith.addf %15, %17 : vector<128x128xf32>
    %c0_13 = arith.constant 0 : index
    %c0_14 = arith.constant 0 : index
    %19 = vector.load %arg6[%c0_13, %c0_14] : memref<128x128xf32, #tpu.memory_space<vmem>>, vector<128x128xf32>
    tpu.vector_store %arg6[%c0_13, %c0_14], %18 {strides = array<i32>} : memref<128x128xf32, #tpu.memory_space<vmem>>, vector<128x128xf32>,
    return
  }
  func.func @transform_0(%arg0: i32) -> (i32, i32) {
    %c0_i32 = arith.constant 0 : i32
    %c0_i32_0 = arith.constant 0 : i32
    return %arg0, %c0_i32 : i32, i32
  }
  func.func @transform_1(%arg0: i32) -> (i32, i32) {
    %c0_i32 = arith.constant 0 : i32
    %c0_i32_0 = arith.constant 0 : i32
    %c0_i32_1 = arith.constant 0 : i32
    return %c0_i32, %c0_i32_0 : i32, i32
  }
  func.func @transform_2(%arg0: i32) -> (i32, i32) {
    %c0_i32 = arith.constant 0 : i32
    %c0_i32_0 = arith.constant 0 : i32
    %c0_i32_1 = arith.constant 0 : i32
    return %c0_i32, %c0_i32_0 : i32, i32
  }
  func.func @transform_3(%arg0: i32) -> (i32, i32) {
    %c0_i32 = arith.constant 0 : i32
    %c0_i32_0 = arith.constant 0 : i32
    %c0_i32_1 = arith.constant 0 : i32
    return %c0_i32, %c0_i32_0 : i32, i32
  }
  func.func @transform_4(%arg0: i32) -> (i32, i32) {
    %c0_i32 = arith.constant 0 : i32
    %c0_i32_0 = arith.constant 0 : i32
    %c0_i32_1 = arith.constant 0 : i32
    return %c0_i32, %c0_i32_0 : i32, i32
  }
  func.func @transform_5(%arg0: i32) -> (i32, i32) {
    %c0_i32 = arith.constant 0 : i32
    %c0_i32_0 = arith.constant 0 : i32
    return %arg0, %c0_i32 : i32, i32
  }
}

</mosaic_0001>

<bundles_post_ra>
// kernel: mlp_forward.1
= control target key start
LH: loop header
LB: loop body
LE: loop exit
PB: predicated region body
PF: predicated region fallthrough
CT: control target
= control target key end

     0   :  { %s1063_s18 = smov 0   ;;  %s1255_s0 = inlined_call_operand.vmem [shape: f32[512,128], index: 0, kind: input, shape index: {}]   ;;  %s1256_s1 = inlined_call_operand.vmem [shape: f32[128,128], index: 1, kind: input, shape index: {}]   ;;  %s1257_s2 = inlined_call_operand.vmem [shape: f32[1,128], index: 2, kind: input, shape index: {}]   ;;  %s1258_s3 = inlined_call_operand.vmem [shape: f32[128,128], index: 3, kind: input, shape index: {}]   ;;  %s1259_s4 = inlined_call_operand.vmem [shape: f32[1,128], index: 4, kind: input, shape index: {}]   ;;  %s1260_s5 = inlined_call_operand.vmem [shape: f32[512,128], index: 5, kind: output, shape index: {}]  }
   0x1 LB: > { %s732_s19 = sadd.s32 4294967295, %s1031_s18   ;;  %p736_p0 = scmp.ge.s32.totalorder %s1031_s18, 1  ;;  %s1031_s18 = sphi %s1063_s18, %s15_s18  }
   0x2   : > { %p188_p1 = scmp.lt.s32.totalorder %s1031_s18, 5 }
   0x4   : > { %p189_p2 = pnand %p736_p0, %p188_p1 }
   0x5   : > { %v244_v0 = vld [vmem:[%s1256_s1] sm:$0xff] (!%p189_p2)  ;;  %v245_v1 = vld [vmem:[%s1256_s1 + $0x8] sm:$0xff] (!%p189_p2)  ;;  %v246_v2 = vld [vmem:[%s1256_s1 + $0x10] sm:$0xff] (!%p189_p2)  ;;  %s737_s26 = sshll.u32 (!%p189_p2), %s732_s19, 4 }
   0x6   : > { %192 = sbr.rel (%p189_p2) target bundleno = 517 (0x205), region = 40  ;;  %v921_v3 = vpack.c.bf16 (!%p189_p2), %v245_v1, %v244_v0  ;;  %v247_v4 = vld [vmem:[%s1256_s1 + $0x18] sm:$0xff] (!%p189_p2)  ;;  %p217_p3 = scmp.lt.s32.totalorder (!%p189_p2), %s737_s26, 63  ;;  %v248_v6 = vld [vmem:[%s1256_s1 + $0x20] sm:$0xff] (!%p189_p2)  ;;  %v249_v7 = vld [vmem:[%s1256_s1 + $0x28] sm:$0xff] (!%p189_p2) }
   0x7   : > { %v925_v5 = vpack.c.bf16 (!%p189_p2), %v247_v4, %v246_v2  ;;  %v929_v8 = vpack.c.bf16 (!%p189_p2), %v249_v7, %v248_v6  ;;  %v250_v9 = vld [vmem:[%s1256_s1 + $0x30] sm:$0xff] (!%p189_p2)  ;;  %v492_v10 = vld [vmem:[%s1258_s3] sm:$0xff] (!%p189_p2)  ;;  %v493_v11 = vld [vmem:[%s1258_s3 + $0x8] sm:$0xff] (!%p189_p2) }
   0x8   : > { %922 = vmatprep.subr.bf16.mxu0 (!%p189_p2), %v921_v3  ;;  %v251_v12 = vld [vmem:[%s1256_s1 + $0x38] sm:$0xff] (!%p189_p2)  ;;  %v953_v13 = vpack.c.bf16 (!%p189_p2), %v493_v11, %v492_v10  ;;  %v494_v14 = vld [vmem:[%s1258_s3 + $0x10] sm:$0xff] (!%p189_p2)  ;;  %v252_v19 = vld [vmem:[%s1256_s1 + $0x40] sm:$0xff] (!%p189_p2) }
   0x9   : > { %924 = vmatpush3.bf16.msra.mxu0 (!%p189_p2), %v921_v3  ;;  %v495_v15 = vld [vmem:[%s1258_s3 + $0x18] sm:$0xff] (!%p189_p2)  ;;  %v933_v18 = vpack.c.bf16 (!%p189_p2), %v251_v12, %v250_v9  ;;  %v253_v20 = vld [vmem:[%s1256_s1 + $0x48] sm:$0xff] (!%p189_p2)  ;;  %v496_v21 = vld [vmem:[%s1258_s3 + $0x20] sm:$0xff] (!%p189_p2) }
   0xa   : > { %926 = vmatprep.subr.bf16.mxu0 (!%p189_p2), %v925_v5  ;;  %v957_v17 = vpack.c.bf16 (!%p189_p2), %v495_v15, %v494_v14  ;;  %954 = vmatprep.subr.bf16.mxu1 (!%p189_p2), %v953_v13  ;;  %v497_v22 = vld [vmem:[%s1258_s3 + $0x28] sm:$0xff] (!%p189_p2)  ;;  %v937_v23 = vpack.c.bf16 (!%p189_p2), %v253_v20, %v252_v19  ;;  %v254_v25 = vld [vmem:[%s1256_s1 + $0x50] sm:$0xff] (!%p189_p2)  ;;  %v255_v26 = vld [vmem:[%s1256_s1 + $0x58] sm:$0xff] (!%p189_p2) }
   0xb   : > { %956 = vmatpush3.bf16.msra.mxu1 (!%p189_p2), %v953_v13  ;;  %v961_v24 = vpack.c.bf16 (!%p189_p2), %v497_v22, %v496_v21  ;;  %v941_v27 = vpack.c.bf16 (!%p189_p2), %v255_v26, %v254_v25  ;;  %v256_v28 = vld [vmem:[%s1256_s1 + $0x60] sm:$0xff] (!%p189_p2)  ;;  %v257_v29 = vld [vmem:[%s1256_s1 + $0x68] sm:$0xff] (!%p189_p2)  ;;  %v258_v31 = vld [vmem:[%s1256_s1 + $0x70] sm:$0xff] (!%p189_p2) }
   0xc   : > { %958 = vmatprep.subr.bf16.mxu1 (!%p189_p2), %v957_v17  ;;  %v945_v30 = vpack.c.bf16 (!%p189_p2), %v257_v29, %v256_v28  ;;  %v259_v32 = vld [vmem:[%s1256_s1 + $0x78] sm:$0xff] (!%p189_p2)  ;;  %v498_v49 = vld [vmem:[%s1258_s3 + $0x30] sm:$0xff] (!%p189_p2)  ;;  %v500_v52 = vld [vmem:[%s1258_s3 + $0x40] sm:$0xff] (!%p189_p2) }
   0xd   : > { %s1262_s26 = smov (!%p217_p3, %s737_s26), 63  ;;  %928 = vmatpush3.bf16.msra.mxu0 %v925_v5  ;;  %v949_v33 = vpack.c.bf16 %v259_v32, %v258_v31  ;;  %v499_v50 = vld [vmem:[%s1258_s3 + $0x38] sm:$0xff]  ;;  %v501_v53 = vld [vmem:[%s1258_s3 + $0x48] sm:$0xff]  ;;  %v502_v55 = vld [vmem:[%s1258_s3 + $0x50] sm:$0xff] }
   0xe   : > { %s738_s10 = sshll.u32 %s1262_s26, 3  ;;  %930 = vmatprep.subr.bf16.mxu0 %v929_v8  ;;  %v965_v51 = vpack.c.bf16 %v499_v50, %v498_v49  ;;  %v969_v54 = vpack.c.bf16 %v501_v53, %v500_v52  ;;  %v503_v56 = vld [vmem:[%s1258_s3 + $0x58] sm:$0xff]  ;;  %v504_v58 = vld [vmem:[%s1258_s3 + $0x60] sm:$0xff]  ;;  %v505_v59 = vld [vmem:[%s1258_s3 + $0x68] sm:$0xff] }
   0xf   : > { %s1109_s20 = scalar_lea.vmem %s1255_s0, %s738_s10  ;;  %960 = vmatpush3.bf16.msra.mxu1 %v957_v17  ;;  %v973_v57 = vpack.c.bf16 %v503_v56, %v502_v55  ;;  %v977_v60 = vpack.c.bf16 %v505_v59, %v504_v58  ;;  %v506_v61 = vld [vmem:[%s1258_s3 + $0x70] sm:$0xff]  ;;  %v507_v62 = vld [vmem:[%s1258_s3 + $0x78] sm:$0xff]  ;;  %v1196_v0 = vld [vmem:[%s1257_s2] ss:$0 sm:$0xff]  ;;  %s1234_s29 = scalar_lea.vmem %s1260_s5, %s738_s10 }
  0x10   : > { %v228_v16 = vld [vmem:[%s1109_s20] sm:$0xff]  ;;  %962 = vmatprep.subr.bf16.mxu1 %v961_v24  ;;  %v229_v34 = vld [vmem:[%s1109_s20 + $0x8] sm:$0xff]  ;;  %v230_v35 = vld [vmem:[%s1109_s20 + $0x10] sm:$0xff]  ;;  %v981_v63 = vpack.c.bf16 %v507_v62, %v506_v61 }
  0x11   : > { %841 = vmatprep.mubr.f32.mxu0 %v228_v16  ;;  %932 = vmatpush3.bf16.msra.mxu0 %v929_v8  ;;  %v231_v36 = vld [vmem:[%s1109_s20 + $0x18] sm:$0xff]  ;;  %v232_v37 = vld [vmem:[%s1109_s20 + $0x20] sm:$0xff]  ;;  %v233_v38 = vld [vmem:[%s1109_s20 + $0x28] sm:$0xff] }
  0x12   : > { %934 = vmatprep.subr.bf16.mxu0 %v933_v18  ;;  %v234_v39 = vld [vmem:[%s1109_s20 + $0x30] sm:$0xff]  ;;  %v235_v40 = vld [vmem:[%s1109_s20 + $0x38] sm:$0xff]  ;;  %v236_v41 = vld [vmem:[%s1109_s20 + $0x40] sm:$0xff] }
  0x13   : > { %964 = vmatpush3.bf16.msra.mxu1 %v961_v24  ;;  %v237_v42 = vld [vmem:[%s1109_s20 + $0x48] sm:$0xff]  ;;  %v238_v43 = vld [vmem:[%s1109_s20 + $0x50] sm:$0xff]  ;;  %v239_v44 = vld [vmem:[%s1109_s20 + $0x58] sm:$0xff] }
  0x14   : > { %v240_v45 = vld [vmem:[%s1109_s20 + $0x60] sm:$0xff]  ;;  %v241_v46 = vld [vmem:[%s1109_s20 + $0x68] sm:$0xff]  ;;  %v242_v47 = vld [vmem:[%s1109_s20 + $0x70] sm:$0xff]  ;;  %966 = vmatprep.subr.bf16.mxu1 %v965_v51 }
  0x15   : > { %936 = vmatpush3.bf16.msra.mxu0 %v933_v18  ;;  %v243_v48 = vld [vmem:[%s1109_s20 + $0x78] sm:$0xff] }
  0x16   : > { %938 = vmatprep.subr.bf16.mxu0 %v937_v23 }
  0x17   : > { %968 = vmatpush3.bf16.msra.mxu1 %v965_v51 }
  0x18   : > { %970 = vmatprep.subr.bf16.mxu1 %v969_v54 }
  0x19   : > { %940 = vmatpush3.bf16.msra.mxu0 %v937_v23 }
  0x1a   : > { %942 = vmatprep.subr.bf16.mxu0 %v941_v27 }
  0x1b   : > { %972 = vmatpush3.bf16.msra.mxu1 %v969_v54 }
  0x1c   : > { %974 = vmatprep.subr.bf16.mxu1 %v973_v57 }
  0x1d   : > { %944 = vmatpush3.bf16.msra.mxu0 %v941_v27 }
  0x1e   : > { %946 = vmatprep.subr.bf16.mxu0 %v945_v30 }
  0x1f   : > { %976 = vmatpush3.bf16.msra.mxu1 %v973_v57 }
  0x20   : > { %978 = vmatprep.subr.bf16.mxu1 %v977_v60 }
  0x21   : > { %948 = vmatpush3.bf16.msra.mxu0 %v945_v30 }
  0x22   : > { %950 = vmatprep.subr.bf16.mxu0 %v949_v33 }
  0x23   : > { %980 = vmatpush3.bf16.msra.mxu1 %v977_v60 }
  0x24   : > { %982 = vmatprep.subr.bf16.mxu1 %v981_v63 }
  0x25   : > { %952 = vmatpush3.bf16.msra.mxu0 %v949_v33 }
  0x27   : > { %984 = vmatpush3.bf16.msra.mxu1 %v981_v63 }
  0x28   : > { %842 = vmatmul.mubr.f32.vlgmr.msra.gmra.mrb[0].mxu0 %v229_v34 }
  0x29   : > { %844 = vmatprep.mubr.f32.mxu0 %v230_v35 }
  0x2c   : > { %845 = vmatmul.mubr.f32.gmra.mrb[2].mxu0 %v231_v36 }
  0x2d   : > { %847 = vmatprep.mubr.f32.mxu0 %v232_v37 }
  0x30   : > { %848 = vmatmul.mubr.f32.gmra.mrb[4].mxu0 %v233_v38 }
  0x31   : > { %850 = vmatprep.mubr.f32.mxu0 %v234_v39 }
  0x34   : > { %851 = vmatmul.mubr.f32.gmra.mrb[6].mxu0 %v235_v40 }
  0x35   : > { %853 = vmatprep.mubr.f32.mxu0 %v236_v41 }
  0x38   : > { %854 = vmatmul.mubr.f32.gmra.mrb[8].mxu0 %v237_v42 }
  0x39   : > { %856 = vmatprep.mubr.f32.mxu0 %v238_v43 }
  0x3c   : > { %857 = vmatmul.mubr.f32.gmra.mrb[10].mxu0 %v239_v44 }
  0x3d   : > { %859 = vmatprep.mubr.f32.mxu0 %v240_v45 }
  0x40   : > { %860 = vmatmul.mubr.f32.gmra.mrb[12].mxu0 %v241_v46 }
  0x41   : > { %862 = vmatprep.mubr.f32.mxu0 %v242_v47 }
  0x44   : > { %863 = vmatmul.mubr.f32.gmra.mrb[14].mxu0 %v243_v48 }
  0xfb   : > { %v843_v1 = vpop.f32.mrb[0].mxu0 }
  0xfc   : > { %v339_v2 = vadd.f32 %v843_v1, %v1196_v0  ;;  %v333_v3 = vpop.f32.mrb[1].mxu0 }
  0xfd   : > { %v334_v4 = vadd.f32 %v1196_v0, %v333_v3 }
  0xfe   : > { %v429_v5 = vmul.f32 0.70710677, %v339_v2  ;;  %v413_v33 = vmul.f32 0.5, %v339_v2 }
  0xff   : > { %v428_v6 = vmul.f32 0.70710677, %v334_v4  ;;  %v846_v7 = vpop.f32.mrb[2].mxu0  ;;  %v412_v31 = vmul.f32 0.5, %v334_v4 }
 0x100   : > { %993 = verf.f32 %v429_v5  ;;  %v349_v8 = vadd.f32 %v846_v7, %v1196_v0  ;;  %v343_v9 = vpop.f32.mrb[3].mxu0 }
 0x101   : > { %995 = verf.f32 %v428_v6  ;;  %v344_v10 = vadd.f32 %v1196_v0, %v343_v9 }
 0x102   : > { %v431_v11 = vmul.f32 0.70710677, %v349_v8  ;;  %v415_v47 = vmul.f32 0.5, %v349_v8 }
 0x103   : > { %v430_v12 = vmul.f32 0.70710677, %v344_v10  ;;  %v849_v13 = vpop.f32.mrb[4].mxu0  ;;  %v414_v43 = vmul.f32 0.5, %v344_v10 }
 0x104   : > { %997 = verf.f32 %v431_v11  ;;  %v359_v14 = vadd.f32 %v849_v13, %v1196_v0  ;;  %v353_v15 = vpop.f32.mrb[5].mxu0 }
 0x105   : > { %999 = verf.f32 %v430_v12  ;;  %v354_v16 = vadd.f32 %v1196_v0, %v353_v15 }
 0x106   : > { %v433_v17 = vmul.f32 0.70710677, %v359_v14  ;;  %v417_v61 = vmul.f32 0.5, %v359_v14 }
 0x107   : > { %v432_v18 = vmul.f32 0.70710677, %v354_v16  ;;  %v852_v19 = vpop.f32.mrb[6].mxu0  ;;  %v416_v57 = vmul.f32 0.5, %v354_v16 }
 0x108   : > { %1001 = verf.f32 %v433_v17  ;;  %v1205_v20 = vadd.f32 %v852_v19, %v1196_v0  ;;  %v363_v21 = vpop.f32.mrb[7].mxu0 }
 0x109   : > { %1003 = verf.f32 %v432_v18  ;;  %v364_v22 = vadd.f32 %v1196_v0, %v363_v21 }
 0x10a   : > { %v994_v23 = vpop.eup %993  ;;  %v435_v24 = vmul.f32 0.70710677, %v1205_v20  ;;  %v419_v12 = vmul.f32 0.5, %v1205_v20 }
 0x10b   : > { %v996_v25 = vpop.eup %995  ;;  %v461_v26 = vadd.f32 1.0, %v994_v23  ;;  %v434_v27 = vmul.f32 0.70710677, %v364_v22  ;;  %v855_v28 = vpop.f32.mrb[8].mxu0  ;;  %v418_v8 = vmul.f32 0.5, %v364_v22 }
 0x10c   : > { %1005 = verf.f32 %v435_v24  ;;  %v1210_v29 = vadd.f32 %v855_v28, %v1196_v0  ;;  %v373_v30 = vpop.f32.mrb[9].mxu0  ;;  %v460_v32 = vadd.f32 1.0, %v996_v25 }
 0x10d   : > { %1007 = verf.f32 %v434_v27  ;;  %v374_v34 = vadd.f32 %v1196_v0, %v373_v30  ;;  %v477_v42 = vmul.f32 %v461_v26, %v413_v33 }
 0x10e   : > { %v998_v35 = vpop.eup %997  ;;  %v437_v36 = vmul.f32 0.70710677, %v1210_v29  ;;  %v476_v37 = vmul.f32 %v460_v32, %v412_v31  ;;  %v421_v24 = vmul.f32 0.5, %v1210_v29 }
 0x10f   : > { %v1000_v38 = vpop.eup %999  ;;  %v463_v39 = vadd.f32 1.0, %v998_v35  ;;  %v436_v40 = vmul.f32 0.70710677, %v374_v34  ;;  %v858_v41 = vpop.f32.mrb[10].mxu0  ;;  %v420_v22 = vmul.f32 0.5, %v374_v34 }
 0x110   : > { %v462_v44 = vadd.f32 1.0, %v1000_v38  ;;  %1009 = verf.f32 %v437_v36  ;;  %v1215_v45 = vadd.f32 %v858_v41, %v1196_v0  ;;  %v383_v46 = vpop.f32.mrb[11].mxu0  ;;  %897 = vmatprep.mubr.f32.mxu1 %v476_v37 }
 0x111   : > { %1011 = verf.f32 %v436_v40  ;;  %v384_v48 = vadd.f32 %v1196_v0, %v383_v46  ;;  %898 = vmatmul.mubr.f32.vlgmr.msra.gmra.mrb[0].mxu1 %v477_v42  ;;  %v479_v56 = vmul.f32 %v463_v39, %v415_v47 }
 0x112   : > { %v1002_v49 = vpop.eup %1001  ;;  %v439_v50 = vmul.f32 0.70710677, %v1215_v45  ;;  %v478_v51 = vmul.f32 %v462_v44, %v414_v43  ;;  %v423_v31 = vmul.f32 0.5, %v1215_v45 }
 0x113   : > { %v1004_v52 = vpop.eup %1003  ;;  %v465_v53 = vadd.f32 1.0, %v1002_v49  ;;  %v438_v54 = vmul.f32 0.70710677, %v384_v48  ;;  %v861_v55 = vpop.f32.mrb[12].mxu0  ;;  %v422_v28 = vmul.f32 0.5, %v384_v48 }
 0x114   : > { %v464_v58 = vadd.f32 1.0, %v1004_v52  ;;  %1013 = verf.f32 %v439_v50  ;;  %v399_v59 = vadd.f32 %v861_v55, %v1196_v0  ;;  %v393_v60 = vpop.f32.mrb[13].mxu0  ;;  %900 = vmatprep.mubr.f32.mxu1 %v478_v51  ;;  %v742_v49 = vld [vmem:[%s1259_s4] ss:$0 sm:$0xff] }
 0x115   : > { %1015 = verf.f32 %v438_v54  ;;  %v394_v62 = vadd.f32 %v1196_v0, %v393_v60  ;;  %901 = vmatmul.mubr.f32.gmra.mrb[2].mxu1 %v479_v56  ;;  %v481_v7 = vmul.f32 %v465_v53, %v417_v61 }
 0x116   : > { %v1006_v63 = vpop.eup %1005  ;;  %v441_v1 = vmul.f32 0.70710677, %v399_v59  ;;  %v480_v2 = vmul.f32 %v464_v58, %v416_v57  ;;  %v425_v38 = vmul.f32 0.5, %v399_v59 }
 0x117   : > { %v1008_v3 = vpop.eup %1007  ;;  %v467_v4 = vadd.f32 1.0, %v1006_v63  ;;  %v440_v5 = vmul.f32 0.70710677, %v394_v62  ;;  %v864_v6 = vpop.f32.mrb[14].mxu0  ;;  %v424_v37 = vmul.f32 0.5, %v394_v62 }
 0x118   : > { %v466_v9 = vadd.f32 1.0, %v1008_v3  ;;  %1017 = verf.f32 %v441_v1  ;;  %v409_v10 = vadd.f32 %v864_v6, %v1196_v0  ;;  %v403_v11 = vpop.f32.mrb[15].mxu0  ;;  %903 = vmatprep.mubr.f32.mxu1 %v480_v2 }
 0x119   : > { %1019 = verf.f32 %v440_v5  ;;  %v404_v13 = vadd.f32 %v1196_v0, %v403_v11  ;;  %904 = vmatmul.mubr.f32.gmra.mrb[4].mxu1 %v481_v7  ;;  %v483_v21 = vmul.f32 %v467_v4, %v419_v12 }
 0x11a   : > { %v1010_v14 = vpop.eup %1009  ;;  %v443_v15 = vmul.f32 0.70710677, %v409_v10  ;;  %v482_v16 = vmul.f32 %v466_v9, %v418_v8  ;;  %v427_v45 = vmul.f32 0.5, %v409_v10 }
 0x11b   : > { %v1012_v17 = vpop.eup %1011  ;;  %v469_v18 = vadd.f32 1.0, %v1010_v14  ;;  %v442_v19 = vmul.f32 0.70710677, %v404_v13  ;;  %v426_v44 = vmul.f32 0.5, %v404_v13 }
 0x11c   : > { %v468_v23 = vadd.f32 1.0, %v1012_v17  ;;  %1021 = verf.f32 %v443_v15  ;;  %906 = vmatprep.mubr.f32.mxu1 %v482_v16 }
 0x11d   : > { %1023 = verf.f32 %v442_v19  ;;  %907 = vmatmul.mubr.f32.gmra.mrb[6].mxu1 %v483_v21  ;;  %v485_v27 = vmul.f32 %v469_v18, %v421_v24 }
 0x11e   : > { %v1014_v20 = vpop.eup %1013  ;;  %v484_v25 = vmul.f32 %v468_v23, %v420_v22 }
 0x11f   : > { %v1016_v26 = vpop.eup %1015  ;;  %v471_v0 = vadd.f32 1.0, %v1014_v20 }
 0x120   : > { %v470_v30 = vadd.f32 1.0, %v1016_v26  ;;  %909 = vmatprep.mubr.f32.mxu1 %v484_v25 }
 0x121   : > { %910 = vmatmul.mubr.f32.gmra.mrb[8].mxu1 %v485_v27  ;;  %v487_v36 = vmul.f32 %v471_v0, %v423_v31 }
 0x122   : > { %v1018_v32 = vpop.eup %1017  ;;  %v486_v33 = vmul.f32 %v470_v30, %v422_v28 }
 0x123   : > { %v1020_v34 = vpop.eup %1019  ;;  %v473_v35 = vadd.f32 1.0, %v1018_v32 }
 0x124   : > { %v472_v29 = vadd.f32 1.0, %v1020_v34  ;;  %912 = vmatprep.mubr.f32.mxu1 %v486_v33 }
 0x125   : > { %913 = vmatmul.mubr.f32.gmra.mrb[10].mxu1 %v487_v36  ;;  %v489_v43 = vmul.f32 %v473_v35, %v425_v38 }
 0x126   : > { %v1022_v39 = vpop.eup %1021  ;;  %v488_v40 = vmul.f32 %v472_v29, %v424_v37 }
 0x127   : > { %v1024_v41 = vpop.eup %1023  ;;  %v475_v42 = vadd.f32 1.0, %v1022_v39 }
 0x128   : > { %v474_v46 = vadd.f32 1.0, %v1024_v41  ;;  %915 = vmatprep.mubr.f32.mxu1 %v488_v40 }
 0x129   : > { %916 = vmatmul.mubr.f32.gmra.mrb[12].mxu1 %v489_v43  ;;  %v491_v48 = vmul.f32 %v475_v42, %v427_v45 }
 0x12a   : > { %v490_v47 = vmul.f32 %v474_v46, %v426_v44 }
 0x12c   : > { %918 = vmatprep.mubr.f32.mxu1 %v490_v47 }
 0x12d   : > { %919 = vmatmul.mubr.f32.gmra.mrb[14].mxu1 %v491_v48 }
 0x1e4   : > { %v899_v50 = vpop.f32.mrb[0].mxu1 }
 0x1e5   : > { %v587_v51 = vadd.f32 %v899_v50, %v742_v49  ;;  %v581_v52 = vpop.f32.mrb[1].mxu1 }
 0x1e6   : > { %v582_v53 = vadd.f32 %v742_v49, %v581_v52 }
 0x1e7   : > { %661 = vst [vmem:[%s1234_s29 + $0x8] sm:$0xff] %v587_v51 }
 0x1e8   : > { %660 = vst [vmem:[%s1234_s29] sm:$0xff] %v582_v53  ;;  %v902_v54 = vpop.f32.mrb[2].mxu1 }
 0x1e9   : > { %v597_v55 = vadd.f32 %v902_v54, %v742_v49  ;;  %v591_v56 = vpop.f32.mrb[3].mxu1 }
 0x1ea   : > { %v592_v57 = vadd.f32 %v742_v49, %v591_v56 }
 0x1eb   : > { %663 = vst [vmem:[%s1234_s29 + $0x18] sm:$0xff] %v597_v55 }
 0x1ec   : > { %662 = vst [vmem:[%s1234_s29 + $0x10] sm:$0xff] %v592_v57  ;;  %v905_v58 = vpop.f32.mrb[4].mxu1 }
 0x1ed   : > { %v607_v59 = vadd.f32 %v905_v58, %v742_v49  ;;  %v601_v60 = vpop.f32.mrb[5].mxu1 }
 0x1ee   : > { %v602_v61 = vadd.f32 %v742_v49, %v601_v60 }
 0x1ef   : > { %665 = vst [vmem:[%s1234_s29 + $0x28] sm:$0xff] %v607_v59 }
 0x1f0   : > { %664 = vst [vmem:[%s1234_s29 + $0x20] sm:$0xff] %v602_v61  ;;  %v908_v62 = vpop.f32.mrb[6].mxu1 }
 0x1f1   : > { %v617_v63 = vadd.f32 %v908_v62, %v742_v49  ;;  %v611_v1 = vpop.f32.mrb[7].mxu1 }
 0x1f2   : > { %v612_v2 = vadd.f32 %v742_v49, %v611_v1 }
 0x1f3   : > { %667 = vst [vmem:[%s1234_s29 + $0x38] sm:$0xff] %v617_v63 }
 0x1f4   : > { %666 = vst [vmem:[%s1234_s29 + $0x30] sm:$0xff] %v612_v2  ;;  %v911_v3 = vpop.f32.mrb[8].mxu1 }
 0x1f5   : > { %v627_v4 = vadd.f32 %v911_v3, %v742_v49  ;;  %v621_v5 = vpop.f32.mrb[9].mxu1 }
 0x1f6   : > { %v622_v6 = vadd.f32 %v742_v49, %v621_v5 }
 0x1f7   : > { %669 = vst [vmem:[%s1234_s29 + $0x48] sm:$0xff] %v627_v4 }
 0x1f8   : > { %668 = vst [vmem:[%s1234_s29 + $0x40] sm:$0xff] %v622_v6  ;;  %v914_v7 = vpop.f32.mrb[10].mxu1 }
 0x1f9   : > { %v637_v8 = vadd.f32 %v914_v7, %v742_v49  ;;  %v631_v9 = vpop.f32.mrb[11].mxu1 }
 0x1fa   : > { %v632_v10 = vadd.f32 %v742_v49, %v631_v9 }
 0x1fb   : > { %671 = vst [vmem:[%s1234_s29 + $0x58] sm:$0xff] %v637_v8 }
 0x1fc   : > { %670 = vst [vmem:[%s1234_s29 + $0x50] sm:$0xff] %v632_v10  ;;  %v917_v11 = vpop.f32.mrb[12].mxu1 }
 0x1fd   : > { %v647_v12 = vadd.f32 %v917_v11, %v742_v49  ;;  %v641_v13 = vpop.f32.mrb[13].mxu1 }
 0x1fe   : > { %v642_v14 = vadd.f32 %v742_v49, %v641_v13 }
 0x1ff   : > { %673 = vst [vmem:[%s1234_s29 + $0x68] sm:$0xff] %v647_v12 }
 0x200   : > { %672 = vst [vmem:[%s1234_s29 + $0x60] sm:$0xff] %v642_v14  ;;  %v920_v15 = vpop.f32.mrb[14].mxu1 }
 0x201   : > { %v657_v16 = vadd.f32 %v920_v15, %v742_v49  ;;  %v651_v17 = vpop.f32.mrb[15].mxu1 }
 0x202   : > { %v652_v18 = vadd.f32 %v742_v49, %v651_v17 }
 0x203   : > { %675 = vst [vmem:[%s1234_s29 + $0x78] sm:$0xff] %v657_v16 }
 0x204   : > { %674 = vst [vmem:[%s1234_s29 + $0x70] sm:$0xff] %v652_v18 }
 0x205 PF: > { %s15_s18 = sadd.s32 1, %s1031_s18  }
 0x206   : > { %p12_p4 = scmp.ge.s32.totalorder %s15_s18, 6  }
 0x208   :  { %14 = sbr.rel (!%p12_p4) target bundleno = 1 (0x1), region = 70 }

</bundles_post_ra>
